<compile_context>
chip_gen: v7x
topology: tpu7x:2x2x1
jax: 0.10.0
libtpu: 0.0.40
codegen_flags: <defaults>
</compile_context>

<pallas_src>
import functools

import jax
import jax.numpy as jnp
from jax.experimental import pallas as pl
from jax.experimental.pallas import tpu as pltpu

EPS = 1e-5


def _round_up(x, m):
    return (x + m - 1) // m * m


def deepfm_passive_kernel(emb_ref, w1_ref, b1_ref, w2_ref, b2_ref, o_ref):
    """Two fused (Linear + folded eval-BN) layers on one batch tile.

    emb_ref : (TILE_B, F*E) bf16   streamed per grid step (double-buffered)
    w1_ref  : (F*E, H)      bf16   VMEM-resident
    b1_ref  : (1, H)        f32    VMEM-resident (BN1 folded in)
    w2_ref  : (H, H)        bf16   VMEM-resident
    b2_ref  : (1, H)        f32    VMEM-resident (BN2 folded in)
    o_ref   : (TILE_B, H)   f32
    """
    x = emb_ref[...]                                                  # bf16
    h = jnp.dot(x, w1_ref[...], preferred_element_type=jnp.float32) + b1_ref[...]
    h = jnp.dot(h.astype(jnp.bfloat16), w2_ref[...],
                preferred_element_type=jnp.float32) + b2_ref[...]
    o_ref[...] = h.astype(o_ref.dtype)


def _fold_bn(w, b, gamma, beta, mean, var):
    """Fold eval-mode BatchNorm1d into the preceding Linear: y = x @ W' + b'."""
    s = gamma * jax.lax.rsqrt(var + EPS)          # (1, H)
    return w * s, (b - mean) * s + beta


@functools.partial(jax.jit, static_argnames=("emb_size",))
def deepfm_passive_forward(x, params, emb_size):
    emb_tables = params["emb_tables"]
    n_feat = len(emb_tables)
    batch = x.shape[0]
    d_in = n_feat * emb_size
    hidden = params["w1"].shape[1]

    # ---- glue: indices / values; gather with Xv folded in (no separate scale array) ----
    Xi = jnp.concatenate([jnp.zeros_like(x[:, :2]), x[:, 2:]], axis=-1).astype(jnp.int32)
    Xv = jnp.concatenate([x[:, :2], jnp.ones_like(x[:, 2:])], axis=-1).astype(jnp.float32)
    emb_list = [emb_tables[i][Xi[:, i]] * Xv[:, i:i + 1] for i in range(n_feat)]
    emb_concat = jnp.concatenate(emb_list, axis=1).astype(jnp.bfloat16)   # (B, F*E)

    # ---- fold eval-mode BN into the Linear layers; weights streamed/resident as bf16 ----
    w1f, b1f = _fold_bn(params["w1"], params["b1"], params["g1"], params["be1"],
                        params["m1"], params["v1"])
    w2f, b2f = _fold_bn(params["w2"], params["b2"], params["g2"], params["be2"],
                        params["m2"], params["v2"])
    w1f = w1f.astype(jnp.bfloat16)
    w2f = w2f.astype(jnp.bfloat16)

    # ---- batch tiling (TILE_B multiple of 16 for bf16 sublane packing) ----
    tile_b = min(256, _round_up(batch, 16))
    b_pad = _round_up(batch, tile_b)
    if b_pad != batch:
        emb_concat = jnp.pad(emb_concat, ((0, b_pad - batch), (0, 0)))
    grid = (b_pad // tile_b,)

    # Working set: 2x emb tile (bf16) + 2x out tile (f32) + resident weights; tiny vs 32 MiB.
    vmem_limit = 32 * 1024 * 1024

    out = pl.pallas_call(
        deepfm_passive_kernel,
        out_shape=jax.ShapeDtypeStruct((b_pad, hidden), jnp.float32),
        grid_spec=pltpu.PrefetchScalarGridSpec(
            num_scalar_prefetch=0,
            grid=grid,
            in_specs=[
                pl.BlockSpec((tile_b, d_in), lambda i: (i, 0)),       # streamed activations
                pl.BlockSpec((d_in, hidden), lambda i: (0, 0)),       # resident W1'
                pl.BlockSpec((1, hidden), lambda i: (0, 0)),          # resident b1'
                pl.BlockSpec((hidden, hidden), lambda i: (0, 0)),     # resident W2'
                pl.BlockSpec((1, hidden), lambda i: (0, 0)),          # resident b2'
            ],
            out_specs=pl.BlockSpec((tile_b, hidden), lambda i: (i, 0)),
        ),
        compiler_params=pltpu.CompilerParams(
            dimension_semantics=("parallel",),
            vmem_limit_bytes=vmem_limit,
        ),
    )(emb_concat, w1f, b1f, w2f, b2f)

    return out[:batch]


def reference_forward(x, params, emb_size):
    """Pure-JAX f32 reference of the original module (eval mode)."""
    emb_tables = params["emb_tables"]
    n_feat = len(emb_tables)
    Xi = jnp.concatenate([jnp.zeros_like(x[:, :2]), x[:, 2:]], axis=-1).astype(jnp.int32)
    Xv = jnp.concatenate([x[:, :2], jnp.ones_like(x[:, 2:])], axis=-1).astype(jnp.float32)
    emb_fm = [emb_tables[i][Xi[:, i]] * Xv[:, i:i + 1] for i in range(n_feat)]
    h = jnp.concatenate(emb_fm, axis=1)
    h = h @ params["w1"] + params["b1"]
    h = (h - params["m1"]) / jnp.sqrt(params["v1"] + EPS) * params["g1"] + params["be1"]
    h = h @ params["w2"] + params["b2"]
    h = (h - params["m2"]) / jnp.sqrt(params["v2"] + EPS) * params["g2"] + params["be2"]
    return h


def make_params(key, feature_sizes, emb_size, hidden_size):
    n_feat = len(feature_sizes)
    d_in = n_feat * emb_size
    keys = jax.random.split(key, n_feat + 8)

    emb_tables = [
        0.1 * jax.random.normal(keys[i], (fz, emb_size), dtype=jnp.float32)
        for i, fz in enumerate(feature_sizes)
    ]
    k = n_feat
    params = {
        "emb_tables": emb_tables,
        # Linear weights stored (in, out) == torch weight.T
        "w1": 0.1 * jax.random.normal(keys[k + 0], (d_in, hidden_size), jnp.float32),
        "b1": 0.1 * jax.random.normal(keys[k + 1], (1, hidden_size), jnp.float32),
        "w2": 0.1 * jax.random.normal(keys[k + 2], (hidden_size, hidden_size), jnp.float32),
        "b2": 0.1 * jax.random.normal(keys[k + 3], (1, hidden_size), jnp.float32),
        # BatchNorm1d (eval): gamma, beta, running_mean, running_var
        "g1": 1.0 + 0.05 * jax.random.normal(keys[k + 4], (1, hidden_size), jnp.float32),
        "be1": 0.05 * jax.random.normal(keys[k + 5], (1, hidden_size), jnp.float32),
        "m1": 0.05 * jax.random.normal(keys[k + 6], (1, hidden_size), jnp.float32),
        "v1": jnp.ones((1, hidden_size), jnp.float32),
        "g2": jnp.ones((1, hidden_size), jnp.float32),
        "be2": jnp.zeros((1, hidden_size), jnp.float32),
        "m2": jnp.zeros((1, hidden_size), jnp.float32),
        "v2": 1.0 + 0.1 * jax.random.uniform(keys[k + 7], (1, hidden_size), jnp.float32),
    }
    return params


if __name__ == "__main__":
    # Small, module-consistent shapes: 8 features (first 2 dense, 6 categorical).
    # hidden_size=128 keeps the kernel output lane-dense (multiple of 128 lanes).
    feature_sizes = [4, 4, 10, 12, 14, 16, 18, 20]
    emb_size = 8
    hidden_size = 128
    batch = 8

    key = jax.random.PRNGKey(0)
    k_params, k_dense, k_idx = jax.random.split(key, 3)
    params = make_params(k_params, feature_sizes, emb_size, hidden_size)

    # Input x: (B, F) float; cols 0-1 dense values, cols 2.. categorical indices (as floats)
    dense = jax.random.uniform(k_dense, (batch, 2), dtype=jnp.float32)
    idx_cols = []
    idx_keys = jax.random.split(k_idx, len(feature_sizes) - 2)
    for j, fz in enumerate(feature_sizes[2:]):
        idx_cols.append(
            jax.random.randint(idx_keys[j], (batch, 1), 0, fz).astype(jnp.float32))
    x = jnp.concatenate([dense] + idx_cols, axis=1)   # (8, 8)

    out = deepfm_passive_forward(x, params, emb_size)
    out = jax.block_until_ready(out)

    ref = reference_forward(x, params, emb_size)
    assert out.shape == (batch, hidden_size)
    # bf16 streaming with f32 accumulation: loosened tolerance vs. the pure-f32 reference.
    max_err = float(jnp.max(jnp.abs(out - ref)))
    assert jnp.allclose(out, ref, atol=3e-2, rtol=3e-2), (
        f"kernel mismatch vs JAX reference (max abs err {max_err})")

    print("KERNEL_OK")
</pallas_src>

<mosaic_0001>
module attributes {stable_mosaic.version = 11 : i64} {
  func.func @deepfm_passive_kernel(%arg0: i32, %arg1: memref<16x64xbf16, #tpu.memory_space<vmem>>, %arg2: memref<64x128xbf16, #tpu.memory_space<vmem>>, %arg3: memref<1x128xf32, #tpu.memory_space<vmem>>, %arg4: memref<128x128xbf16, #tpu.memory_space<vmem>>, %arg5: memref<1x128xf32, #tpu.memory_space<vmem>>, %arg6: memref<16x128xf32, #tpu.memory_space<vmem>>) attributes {dimension_semantics = [#tpu.dimension_semantics<parallel>], iteration_bounds = array<i64: 1>, scalar_prefetch = 0 : i64, scratch_operands = 0 : i64, tpu.core_type = #tpu.core_type<tc>, window_params = [{transform_indices = @transform_0, window_bounds = array<i64: 16, 64>}, {pipeline_mode = #tpu.pipeline_mode<synchronous>, transform_indices = @transform_1, window_bounds = array<i64: 64, 128>}, {pipeline_mode = #tpu.pipeline_mode<synchronous>, transform_indices = @transform_2, window_bounds = array<i64: 1, 128>}, {pipeline_mode = #tpu.pipeline_mode<synchronous>, transform_indices = @transform_3, window_bounds = array<i64: 128, 128>}, {pipeline_mode = #tpu.pipeline_mode<synchronous>, transform_indices = @transform_4, window_bounds = array<i64: 1, 128>}, {transform_indices = @transform_5, window_bounds = array<i64: 16, 128>}]} {
    %c0 = arith.constant 0 : index
    %c0_0 = arith.constant 0 : index
    %0 = vector.load %arg1[%c0, %c0_0] : memref<16x64xbf16, #tpu.memory_space<vmem>>, vector<16x64xbf16>
    %c0_1 = arith.constant 0 : index
    %c0_2 = arith.constant 0 : index
    %1 = vector.load %arg2[%c0_1, %c0_2] : memref<64x128xbf16, #tpu.memory_space<vmem>>, vector<64x128xbf16>
    %cst = arith.constant dense<0.000000e+00> : vector<16x128xf32>
    %2 = tpu.matmul %0, %1, %cst {dimension_numbers = #tpu.dot_dimension_numbers<[1], [0], [0], [1], [0, 0, 1, 1], [], []>} : vector<16x64xbf16>, vector<64x128xbf16>, vector<16x128xf32> -> vector<16x128xf32>
    %c0_3 = arith.constant 0 : index
    %c0_4 = arith.constant 0 : index
    %3 = vector.load %arg3[%c0_3, %c0_4] : memref<1x128xf32, #tpu.memory_space<vmem>>, vector<1x128xf32>
    %4 = vector.broadcast %3 : vector<1x128xf32> to vector<16x128xf32>
    %5 = arith.addf %2, %4 : vector<16x128xf32>
    %6 = arith.truncf %5 : vector<16x128xf32> to vector<16x128xbf16>
    %c0_5 = arith.constant 0 : index
    %c0_6 = arith.constant 0 : index
    %7 = vector.load %arg4[%c0_5, %c0_6] : memref<128x128xbf16, #tpu.memory_space<vmem>>, vector<128x128xbf16>
    %cst_7 = arith.constant dense<0.000000e+00> : vector<16x128xf32>
    %8 = tpu.matmul %6, %7, %cst_7 {dimension_numbers = #tpu.dot_dimension_numbers<[1], [0], [0], [1], [0, 0, 1, 1], [], []>} : vector<16x128xbf16>, vector<128x128xbf16>, vector<16x128xf32> -> vector<16x128xf32>
    %c0_8 = arith.constant 0 : index
    %c0_9 = arith.constant 0 : index
    %9 = vector.load %arg5[%c0_8, %c0_9] : memref<1x128xf32, #tpu.memory_space<vmem>>, vector<1x128xf32>
    %10 = vector.broadcast %9 : vector<1x128xf32> to vector<16x128xf32>
    %11 = arith.addf %8, %10 : vector<16x128xf32>
    %c0_10 = arith.constant 0 : index
    %c0_11 = arith.constant 0 : index
    %12 = vector.load %arg6[%c0_10, %c0_11] : memref<16x128xf32, #tpu.memory_space<vmem>>, vector<16x128xf32>
    tpu.vector_store %arg6[%c0_10, %c0_11], %11 {strides = array<i32>} : memref<16x128xf32, #tpu.memory_space<vmem>>, vector<16x128xf32>,
    return
  }
  func.func @transform_0(%arg0: i32) -> (i32, i32) {
    %c0_i32 = arith.constant 0 : i32
    %c0_i32_0 = arith.constant 0 : i32
    return %arg0, %c0_i32 : i32, i32
  }
  func.func @transform_1(%arg0: i32) -> (i32, i32) {
    %c0_i32 = arith.constant 0 : i32
    %c0_i32_0 = arith.constant 0 : i32
    %c0_i32_1 = arith.constant 0 : i32
    return %c0_i32, %c0_i32_0 : i32, i32
  }
  func.func @transform_2(%arg0: i32) -> (i32, i32) {
    %c0_i32 = arith.constant 0 : i32
    %c0_i32_0 = arith.constant 0 : i32
    %c0_i32_1 = arith.constant 0 : i32
    return %c0_i32, %c0_i32_0 : i32, i32
  }
  func.func @transform_3(%arg0: i32) -> (i32, i32) {
    %c0_i32 = arith.constant 0 : i32
    %c0_i32_0 = arith.constant 0 : i32
    %c0_i32_1 = arith.constant 0 : i32
    return %c0_i32, %c0_i32_0 : i32, i32
  }
  func.func @transform_4(%arg0: i32) -> (i32, i32) {
    %c0_i32 = arith.constant 0 : i32
    %c0_i32_0 = arith.constant 0 : i32
    %c0_i32_1 = arith.constant 0 : i32
    return %c0_i32, %c0_i32_0 : i32, i32
  }
  func.func @transform_5(%arg0: i32) -> (i32, i32) {
    %c0_i32 = arith.constant 0 : i32
    %c0_i32_0 = arith.constant 0 : i32
    return %arg0, %c0_i32 : i32, i32
  }
}

</mosaic_0001>

<bundles_post_ra>
// kernel: deepfm_passive_forward.1
= control target key start
LH: loop header
LB: loop body
LE: loop exit
PB: predicated region body
PF: predicated region fallthrough
CT: control target
= control target key end

     0   :  { %v308_v0 = vmov 0.0   ;;  %vm309_vm0 = vmmov 0   ;;  %vm67_vm1 = vcmask 523264   ;;  %s391_s1 = inlined_call_operand.vmem [shape: bf16[64,128], index: 1, kind: input, shape index: {}]   ;;  %s392_s3 = inlined_call_operand.vmem [shape: bf16[128,128], index: 3, kind: input, shape index: {}]   ;;  %s393_s0 = inlined_call_operand.vmem [shape: bf16[16,64], index: 0, kind: input, shape index: {}]   ;;  %s394_s2 = inlined_call_operand.vmem [shape: f32[1,128], index: 2, kind: input, shape index: {}]   ;;  %s395_s4 = inlined_call_operand.vmem [shape: f32[1,128], index: 4, kind: input, shape index: {}]   ;;  %s396_s5 = inlined_call_operand.vmem [shape: f32[16,128], index: 5, kind: output, shape index: {}]  }
   0x1   :  { %261 = vmatprep.subr.bf16.mxu0 %v308_v0  ;;  %v295_v1 = vld [vmem:[%s391_s1] sm:$0xff]   ;;  %269 = vmatprep.mubr.msk.bf16.mxu0 %vm309_vm0, %v308_v0  ;;  %v296_v2 = vld [vmem:[%s391_s1 + $0x8] sm:$0xff]   ;;  %v297_v4 = vld [vmem:[%s391_s1 + $0x10] sm:$0xff]  }
   0x2   :  { %273 = vmatprep.subr.bf16.mxu1 %v308_v0  ;;  %289 = vmatprep.mubr.msk.bf16.mxu1 %vm309_vm0, %v308_v0  ;;  %v300_v3 = vld [vmem:[%s392_s3] sm:$0xff]   ;;  %v301_v5 = vld [vmem:[%s392_s3 + $0x8] sm:$0xff]   ;;  %v298_v6 = vld [vmem:[%s391_s1 + $0x18] sm:$0xff]  }
   0x3   :  { %262 = vmatpush3.bf16.msra.mxu0 %v295_v1  ;;  %274 = vmatpush3.bf16.msra.mxu1 %v300_v3  ;;  %v302_v7 = vld [vmem:[%s392_s3 + $0x10] sm:$0xff]   ;;  %v299_v8 = vld [vmem:[%s393_s0] sm:$0xff]   ;;  %v303_v9 = vld [vmem:[%s392_s3 + $0x18] sm:$0xff]  }
   0x4   :  { %263 = vmatprep.subr.bf16.mxu0 %v308_v0  ;;  %275 = vmatprep.subr.bf16.mxu1 %v308_v0  ;;  %v304_v10 = vld [vmem:[%s392_s3 + $0x20] sm:$0xff]   ;;  %v305_v11 = vld [vmem:[%s392_s3 + $0x28] sm:$0xff]   ;;  %v306_v12 = vld [vmem:[%s392_s3 + $0x30] sm:$0xff]  }
   0x5   :  { %v307_v13 = vld [vmem:[%s392_s3 + $0x38] sm:$0xff]   ;;  %v231_v14 = vld [vmem:[%s394_s2] ss:$0 sm:$0xff] }
   0x6   :  { %v238_v22 = vld [vmem:[%s395_s4] ss:$0 sm:$0xff] }
   0x7   :  { %264 = vmatpush3.bf16.msra.mxu0 %v296_v2  ;;  %276 = vmatpush3.bf16.msra.mxu1 %v301_v5 }
   0x8   :  { %265 = vmatprep.subr.bf16.mxu0 %v308_v0  ;;  %277 = vmatprep.subr.bf16.mxu1 %v308_v0 }
   0xb   :  { %266 = vmatpush3.bf16.msra.mxu0 %v297_v4  ;;  %278 = vmatpush3.bf16.msra.mxu1 %v302_v7 }
   0xc   :  { %267 = vmatprep.subr.bf16.mxu0 %v308_v0  ;;  %279 = vmatprep.subr.bf16.mxu1 %v308_v0 }
   0xf   :  { %268 = vmatpush3.bf16.msra.mxu0 %v298_v6  ;;  %280 = vmatpush3.bf16.msra.mxu1 %v303_v9 }
  0x10   :  { %281 = vmatprep.subr.bf16.mxu1 %v308_v0 }
  0x12   :  { %270 = vmatmul.mubr.msk.bf16.vlgmr.msra.gmra.mrb[0].mxu0 %vm67_vm1, %v299_v8 }
  0x13   :  { %282 = vmatpush3.bf16.msra.mxu1 %v304_v10 }
  0x14   :  { %283 = vmatprep.subr.bf16.mxu1 %v308_v0 }
  0x17   :  { %284 = vmatpush3.bf16.msra.mxu1 %v305_v11 }
  0x18   :  { %285 = vmatprep.subr.bf16.mxu1 %v308_v0 }
  0x1b   :  { %286 = vmatpush3.bf16.msra.mxu1 %v306_v12 }
  0x1c   :  { %287 = vmatprep.subr.bf16.mxu1 %v308_v0 }
  0x1f   :  { %288 = vmatpush3.bf16.msra.mxu1 %v307_v13 }
  0xe5   :  { %v105_v15 = vpop.f32.mrb[0].mxu0 }
  0xe6   :  { %v271_v16 = vpop.f32.mrb[1].mxu0  ;;  %v106_v18 = vadd.f32 %v231_v14, %v105_v15 }
  0xe7   :  { %v108_v17 = vpop.f32.mrb[2].mxu0 }
  0xe8   :  { %v109_v19 = vadd.f32 %v231_v14, %v108_v17  ;;  %v272_v20 = vpop.f32.mrb[3].mxu0 }
  0xea   :  { %v112_v21 = vpack.c.bf16 %v109_v19, %v106_v18 }
  0xec   :  { %290 = vmatmul.mubr.bf16.vlgmr.msra.gmra.mrb[0].mxu1 %v112_v21 }
 0x1bf   :  { %v218_v23 = vpop.f32.mrb[0].mxu1 }
 0x1c0   :  { %v219_v24 = vadd.f32 %v238_v22, %v218_v23  ;;  %v291_v25 = vpop.f32.mrb[1].mxu1 }
 0x1c1   :  { %v221_v26 = vpop.f32.mrb[2].mxu1 }
 0x1c2   :  { %225 = vst [vmem:[%s396_s5] sm:$0xff] %v219_v24  ;;  %v222_v27 = vadd.f32 %v238_v22, %v221_v26  ;;  %v292_v28 = vpop.f32.mrb[3].mxu1 }
 0x1c4   :  { %226 = vst [vmem:[%s396_s5 + $0x8] sm:$0xff] %v222_v27 }

</bundles_post_ra>
